<compile_context>
chip_gen: v6e
topology: v6e:2x2x1
jax: 0.10.0
libtpu: 0.0.40
codegen_flags: <defaults>
</compile_context>

<pallas_src>
import functools
from typing import List, Optional, Tuple

import jax
import jax.numpy as jnp
from jax.experimental import pallas as pl
from jax.experimental.pallas import tpu as pltpu

_LANE = 128      # lane width (last-dim tiling unit)
_SUBLANE = 8     # f32 sublane count (second-last-dim tiling unit)


def _round_up(n: int, m: int) -> int:
    return ((n + m - 1) // m) * m


def _mlp_kernel(num_layers: int, x_ref, *refs):
    """refs = (w0, b0, w1, b1, ..., w_{L-1}, b_{L-1}, out_ref)."""
    out_ref = refs[-1]
    param_refs = refs[:-1]

    h = x_ref[...].astype(jnp.float32)
    for layer in range(num_layers):
        w = param_refs[2 * layer][...]
        b = param_refs[2 * layer + 1][...]
        # MXU matmul with f32 accumulation; bias add / ReLU in f32 on the VPU.
        h = jnp.dot(h, w, preferred_element_type=jnp.float32) + b.astype(jnp.float32)
        if layer != num_layers - 1:  # ReLU on hidden layers only
            h = jnp.maximum(h, 0.0)
    out_ref[...] = h.astype(out_ref.dtype)


def discrete_action_value_forward(
    states: jax.Array,
    params: List[Tuple[jax.Array, jax.Array]],
    *,
    tile_m: int = 256,
    param_dtype: Optional[jnp.dtype] = None,
) -> jax.Array:
    """states: [batch, state_dim] f32; params: list of (W [in, out], b [out])."""
    batch, state_dim = states.shape
    num_actions = params[-1][0].shape[1]
    num_layers = len(params)

    # ---- Lane-dense output: zero-pad the final layer to a multiple of 128 cols.
    params = [(w, b) for (w, b) in params]
    padded_actions = _round_up(num_actions, _LANE)
    if padded_actions != num_actions:
        w_last, b_last = params[-1]
        pad = padded_actions - num_actions
        params[-1] = (
            jnp.pad(w_last, ((0, 0), (0, pad))),
            jnp.pad(b_last, ((0, pad),)),
        )

    # ---- Optional bf16 weight storage (halves weight DMA; f32 accumulation).
    if param_dtype is not None:
        params = [(w.astype(param_dtype), b) for (w, b) in params]

    # ---- Batch padding / tiling decision.
    if batch <= tile_m:
        tile = _round_up(batch, _SUBLANE)
        grid = None                      # grid-less: no pipeline scaffolding
    else:
        # Balanced tiles: minimize padded rows while keeping tile a multiple of
        # the f32 sublane count and <= tile_m.
        num_tiles = pl.cdiv(batch, tile_m)
        tile = _round_up(pl.cdiv(batch, num_tiles), _SUBLANE)
        grid = (pl.cdiv(batch, tile),)
    padded_batch = _round_up(batch, tile)
    if padded_batch != batch:
        states = jnp.pad(states, ((0, padded_batch - batch), (0, 0)))

    # Flatten params; biases reshaped to [1, out] so every operand is 2-D.
    flat_params: List[jax.Array] = []
    for w, b in params:
        flat_params.append(w)
        flat_params.append(b.reshape(1, -1))

    kernel = functools.partial(_mlp_kernel, num_layers)
    out_shape = jax.ShapeDtypeStruct((padded_batch, padded_actions), states.dtype)

    if grid is None:
        # Single-shot kernel: whole arrays resident in VMEM, no grid.
        out = pl.pallas_call(
            kernel,
            out_shape=out_shape,
            in_specs=[pl.BlockSpec(memory_space=pltpu.MemorySpace.VMEM)]
            * (1 + len(flat_params)),
            out_specs=pl.BlockSpec(memory_space=pltpu.MemorySpace.VMEM),
        )(states, *flat_params)
    else:
        # Batch-tiled grid: states/out walk the batch axis; weights/biases use a
        # constant block index so they stay VMEM-resident (no per-step re-DMA).
        in_specs = [pl.BlockSpec((tile, state_dim), lambda i: (i, 0))]
        for a in flat_params:
            # Bind ndim via a default argument (avoid late-binding closure bug).
            in_specs.append(pl.BlockSpec(a.shape, lambda i, nd=a.ndim: (0,) * nd))
        out_specs = pl.BlockSpec((tile, padded_actions), lambda i: (i, 0))
        out = pl.pallas_call(
            kernel,
            out_shape=out_shape,
            grid=grid,
            in_specs=in_specs,
            out_specs=out_specs,
            compiler_params=pltpu.CompilerParams(
                dimension_semantics=("parallel",),  # shard batch over v7x's 2 TCs
            ),
        )(states, *flat_params)

    # Strip batch padding and the lane padding of the final layer.
    return out[:batch, :num_actions]


def init_mlp_params(
    key: jax.Array, input_dim: int, widths: List[int], output_dim: int
) -> List[Tuple[jax.Array, jax.Array]]:
    """Deterministic init mimicking torch.nn.Linear defaults (U[-1/sqrt(fan_in), +])."""
    dims = [input_dim] + list(widths) + [output_dim]
    params = []
    for i in range(len(dims) - 1):
        fan_in, fan_out = dims[i], dims[i + 1]
        key, kw, kb = jax.random.split(key, 3)
        bound = 1.0 / jnp.sqrt(jnp.float32(fan_in))
        w = jax.random.uniform(kw, (fan_in, fan_out), jnp.float32, -bound, bound)
        b = jax.random.uniform(kb, (fan_out,), jnp.float32, -bound, bound)
        params.append((w, b))
    return params


def reference_forward(states, params):
    h = states
    for i, (w, b) in enumerate(params):
        h = h @ w + b
        if i != len(params) - 1:
            h = jnp.maximum(h, 0.0)
    return h


if __name__ == "__main__":
    # Synthetic env: state_dim = 16 observations, num_actions = 4 discrete actions.
    state_dim = 16
    num_actions = 4
    mlp_widths = [32, 32]

    key = jax.random.PRNGKey(0)
    key, k_params = jax.random.split(key)
    params = init_mlp_params(k_params, state_dim, mlp_widths, num_actions)

    # batch=8 exercises the grid-less single-shot path; batch=300 exercises the
    # batch-tiled grid path (grid=(2,), balanced 152-row tiles -> pad to 304
    # rows instead of 512, lane-dense 128-wide output).
    for batch in (8, 300):
        key, k_states = jax.random.split(key)
        states = jax.random.normal(k_states, (batch, state_dim), jnp.float32)

        action_values = discrete_action_value_forward(states, params)
        action_values = jax.block_until_ready(action_values)

        expected = reference_forward(states, params)
        assert action_values.shape == (batch, num_actions), action_values.shape
        assert jnp.allclose(action_values, expected, atol=1e-5, rtol=1e-5), (
            f"mismatch vs reference at batch={batch}"
        )

    print("KERNEL_OK")
</pallas_src>

<mosaic_0001>
module attributes {stable_mosaic.version = 11 : i64} {
  func.func @_mlp_kernel(%arg0: memref<8x16xf32, #tpu.memory_space<vmem>>, %arg1: memref<16x32xf32, #tpu.memory_space<vmem>>, %arg2: memref<1x32xf32, #tpu.memory_space<vmem>>, %arg3: memref<32x32xf32, #tpu.memory_space<vmem>>, %arg4: memref<1x32xf32, #tpu.memory_space<vmem>>, %arg5: memref<32x128xf32, #tpu.memory_space<vmem>>, %arg6: memref<1x128xf32, #tpu.memory_space<vmem>>, %arg7: memref<8x128xf32, #tpu.memory_space<vmem>>) attributes {dimension_semantics = [], scalar_prefetch = 0 : i64, scratch_operands = 0 : i64, tpu.core_type = #tpu.core_type<tc>} {
    %c0 = arith.constant 0 : index
    %c0_0 = arith.constant 0 : index
    %0 = vector.load %arg0[%c0, %c0_0] : memref<8x16xf32, #tpu.memory_space<vmem>>, vector<8x16xf32>
    %c0_1 = arith.constant 0 : index
    %c0_2 = arith.constant 0 : index
    %1 = vector.load %arg1[%c0_1, %c0_2] : memref<16x32xf32, #tpu.memory_space<vmem>>, vector<16x32xf32>
    %c0_3 = arith.constant 0 : index
    %c0_4 = arith.constant 0 : index
    %2 = vector.load %arg2[%c0_3, %c0_4] : memref<1x32xf32, #tpu.memory_space<vmem>>, vector<1x32xf32>
    %cst = arith.constant dense<0.000000e+00> : vector<8x32xf32>
    %3 = tpu.matmul %0, %1, %cst {dimension_numbers = #tpu.dot_dimension_numbers<[1], [0], [0], [1], [0, 0, 1, 1], [], []>} : vector<8x16xf32>, vector<16x32xf32>, vector<8x32xf32> -> vector<8x32xf32>
    %4 = vector.broadcast %2 : vector<1x32xf32> to vector<8x32xf32>
    %5 = arith.addf %3, %4 : vector<8x32xf32>
    %cst_5 = arith.constant 0.000000e+00 : f32
    %6 = vector.broadcast %cst_5 : f32 to vector<8x32xf32>
    %7 = arith.maximumf %5, %6 : vector<8x32xf32>
    %c0_6 = arith.constant 0 : index
    %c0_7 = arith.constant 0 : index
    %8 = vector.load %arg3[%c0_6, %c0_7] : memref<32x32xf32, #tpu.memory_space<vmem>>, vector<32x32xf32>
    %c0_8 = arith.constant 0 : index
    %c0_9 = arith.constant 0 : index
    %9 = vector.load %arg4[%c0_8, %c0_9] : memref<1x32xf32, #tpu.memory_space<vmem>>, vector<1x32xf32>
    %cst_10 = arith.constant dense<0.000000e+00> : vector<8x32xf32>
    %10 = tpu.matmul %7, %8, %cst_10 {dimension_numbers = #tpu.dot_dimension_numbers<[1], [0], [0], [1], [0, 0, 1, 1], [], []>} : vector<8x32xf32>, vector<32x32xf32>, vector<8x32xf32> -> vector<8x32xf32>
    %11 = vector.broadcast %9 : vector<1x32xf32> to vector<8x32xf32>
    %12 = arith.addf %10, %11 : vector<8x32xf32>
    %cst_11 = arith.constant 0.000000e+00 : f32
    %13 = vector.broadcast %cst_11 : f32 to vector<8x32xf32>
    %14 = arith.maximumf %12, %13 : vector<8x32xf32>
    %c0_12 = arith.constant 0 : index
    %c0_13 = arith.constant 0 : index
    %15 = vector.load %arg5[%c0_12, %c0_13] : memref<32x128xf32, #tpu.memory_space<vmem>>, vector<32x128xf32>
    %c0_14 = arith.constant 0 : index
    %c0_15 = arith.constant 0 : index
    %16 = vector.load %arg6[%c0_14, %c0_15] : memref<1x128xf32, #tpu.memory_space<vmem>>, vector<1x128xf32>
    %cst_16 = arith.constant dense<0.000000e+00> : vector<8x128xf32>
    %17 = tpu.matmul %14, %15, %cst_16 {dimension_numbers = #tpu.dot_dimension_numbers<[1], [0], [0], [1], [0, 0, 1, 1], [], []>} : vector<8x32xf32>, vector<32x128xf32>, vector<8x128xf32> -> vector<8x128xf32>
    %18 = vector.broadcast %16 : vector<1x128xf32> to vector<8x128xf32>
    %19 = arith.addf %17, %18 : vector<8x128xf32>
    %c0_17 = arith.constant 0 : index
    %c0_18 = arith.constant 0 : index
    %20 = vector.load %arg7[%c0_17, %c0_18] : memref<8x128xf32, #tpu.memory_space<vmem>>, vector<8x128xf32>
    tpu.vector_store %arg7[%c0_17, %c0_18], %19 {strides = array<i32>} : memref<8x128xf32, #tpu.memory_space<vmem>>, vector<8x128xf32>,
    return
  }
}

</mosaic_0001>

<bundles_post_ra>
// kernel: tpu_custom_call.1
= control target key start
LH: loop header
LB: loop body
LE: loop exit
PB: predicated region body
PF: predicated region fallthrough
CT: control target
= control target key end

     0   :  { %12 = vsyncpa [#allocation3], 0  ;;  %s605_s0 = inlined_call_operand.hbm [shape: f32[8,16], index: 0, kind: input, shape index: {}]   ;;  %s606_s1 = inlined_call_operand.hbm [shape: f32[16,32], index: 1, kind: input, shape index: {}]   ;;  %s607_s2 = inlined_call_operand.vmem [shape: f32[1,32], index: 2, kind: input, shape index: {}]   ;;  %s608_s3 = inlined_call_operand.hbm [shape: f32[32,32], index: 3, kind: input, shape index: {}]   ;;  %s609_s4 = inlined_call_operand.vmem [shape: f32[1,32], index: 4, kind: input, shape index: {}]   ;;  %s610_s5 = inlined_call_operand.hbm [shape: f32[32,128], index: 5, kind: input, shape index: {}]   ;;  %s611_s6 = inlined_call_operand.vmem [shape: f32[1,128], index: 6, kind: input, shape index: {}]   ;;  %s612_s7 = inlined_call_operand.hbm [shape: f32[8,128], index: 7, kind: output, shape index: {}]  }
   0x1   :  { %13 = vsyncpa [#allocation6], 0 }
   0x2   :  { %14 = vsyncpa [#allocation9], 0 }
   0x3   :  { %15 = vsyncpa [#allocation4], 0  ;;  %s518_s24 = smov [#allocation5]  }
   0x4   :  { %s31_s25 = sshll.u32 %s518_s24, 4  ;;  %s32_s25 = int_to_ptr.vmem [resolvable:$true] %s31_s25 }
   0x5   :  { %s418_s26 = scalar_lea.vmem %s32_s25, 256  ;;  %p423_p1 = scmp.lt.s32.totalorder %s32_s25, %s32_s25 }
   0x6   :  { %p419_p0 = scmp.ne.s32.totalorder %s32_s25, %s418_s26  ;;  %p424_p2 = scmp.lt.s32.totalorder %s418_s26, %s418_s26 }
   0x8   :  { %p425_p3 = por %p424_p2, %p423_p1 }
   0xa   :  { %p426_p4 = pnand %p425_p3, %p419_p0 }
   0xc   :  { %429 = shalt.err (!%p426_p4)
}
   0xd   :  { %s519_s27 = smov 128   ;;  %s520_s28 = smov 8  }
   0xe   :  { %37 = dma.hbm_to_vmem [thread:$0]  %s606_s1, 256, %s32_s25, [#allocation6], %s519_s27, %s519_s27, %s520_s28  }
   0xf   :  { %s521_s8 = smov [#allocation2]   ;;  %s522_s10 = smov [#allocation7]  }
  0x10   :  { %s22_s9 = sshll.u32 %s521_s8, 4  ;;  %s45_s11 = sshll.u32 %s522_s10, 4  ;;  %s23_s9 = int_to_ptr.vmem [resolvable:$true] %s22_s9  ;;  %s46_s11 = int_to_ptr.vmem [resolvable:$true] %s45_s11 }
  0x11   :  { %s438_s12 = scalar_lea.vmem %s23_s9, 128  ;;  %p443_p6 = scmp.lt.s32.totalorder %s23_s9, %s23_s9 }
  0x12   :  { %p439_p5 = scmp.ne.s32.totalorder %s23_s9, %s438_s12  ;;  %p444_p7 = scmp.lt.s32.totalorder %s438_s12, %s438_s12 }
  0x14   :  { %p445_p8 = por %p444_p7, %p443_p6 }
  0x16   :  { %p446_p9 = pnand %p445_p8, %p439_p5 }
  0x18   :  { %449 = shalt.err (!%p446_p9)
}
  0x19   :  { %25 = dma.hbm_to_vmem [thread:$0]  %s605_s0, 128, %s23_s9, [#allocation3]  }
  0x1a   :  { %s458_s15 = scalar_lea.vmem %s46_s11, 512  ;;  %p463_p11 = scmp.lt.s32.totalorder %s46_s11, %s46_s11 }
  0x1b   :  { %p459_p10 = scmp.ne.s32.totalorder %s46_s11, %s458_s15  ;;  %p464_p12 = scmp.lt.s32.totalorder %s458_s15, %s458_s15 }
  0x1d   :  { %p465_p13 = por %p464_p12, %p463_p11 }
  0x1f   :  { %p466_p0 = pnand %p465_p13, %p459_p10 }
  0x21   :  { %469 = shalt.err (!%p466_p0)
}
  0x22   :  { %51 = dma.hbm_to_vmem [thread:$0]  %s608_s3, 512, %s46_s11, [#allocation6], %s519_s27, %s519_s27, %s520_s28  }
  0x23   :  { %s523_s17 = smov [#allocation8]  }
  0x24   :  { %s59_s18 = sshll.u32 %s523_s17, 4  ;;  %s60_s18 = int_to_ptr.vmem [resolvable:$true] %s59_s18 }
  0x25   :  { %s478_s19 = scalar_lea.vmem %s60_s18, 512  ;;  %p483_p2 = scmp.lt.s32.totalorder %s60_s18, %s60_s18 }
  0x26   :  { %p479_p1 = scmp.ne.s32.totalorder %s60_s18, %s478_s19  ;;  %p484_p3 = scmp.lt.s32.totalorder %s478_s19, %s478_s19 }
  0x28   :  { %p485_p4 = por %p484_p3, %p483_p2 }
  0x2a   :  { %p486_p5 = pnand %p485_p4, %p479_p1 }
  0x2c   :  { %489 = shalt.err (!%p486_p5)
}
  0x2d   :  { %65 = dma.hbm_to_vmem [thread:$0]  %s610_s5, 512, %s60_s18, [#allocation9], %s519_s27, %s519_s27, %s520_s28  }
  0x2e   :  { %510 = dma.done.wait [#allocation3], 128  }
  0x2f   :  { %511 = vsyncadd [#allocation3], 4294967168 }
  0x30   :  { %512 = dma.done.wait [#allocation6], 768  }
  0x31   :  { %513 = vsyncadd [#allocation6], 4294966528 }
  0x32   :  { %514 = dma.done.wait [#allocation9], 512  }
  0x33   :  { %515 = vsyncadd [#allocation9], 4294966784  ;;  %v524_v0 = vmov 0.0   ;;  %vm525_vm0 = vmmov 0   ;;  %v82_v1 = vld [vmem:[#allocation5 + $0x8] sm:$0xff]  ;;  %v81_v2 = vld [vmem:[#allocation5] sm:$0xff] }
  0x34   :  { %372 = vmatprep.subr.mxu0 %v524_v0  ;;  %376 = vmatprep.mubr.msk.f32.mxu0 %vm525_vm0, %v524_v0  ;;  %v80_v3 = vld [vmem:[#allocation2] sm:$0xff]  ;;  %vm90_vm1 = vcmask 130048   ;;  %v168_v4 = vld [vmem:[#allocation7 + $0x18] sm:$0xff]  ;;  %v167_v5 = vld [vmem:[#allocation7 + $0x10] sm:$0xff]  ;;  %vm176_vm2 = vcmask 261120   ;;  %s526_s24 = smov [#allocation10]  }
  0x35   :  { %379 = vmatprep.subr.mxu1 %v524_v0  ;;  %387 = vmatprep.mubr.msk.f32.mxu1 %vm525_vm0, %v524_v0  ;;  %v166_v6 = vld [vmem:[#allocation7 + $0x8] sm:$0xff]  ;;  %v165_v7 = vld [vmem:[#allocation7] sm:$0xff]  ;;  %v254_v8 = vld [vmem:[#allocation8 + $0x18] sm:$0xff]  ;;  %s342_s25 = sshll.u32 %s526_s24, 4  ;;  %s343_s25 = int_to_ptr.vmem [resolvable:$true] %s342_s25 }
  0x36   :  { %373 = vmatpush3.msra.mxu0 %v82_v1  ;;  %380 = vmatpush3.msra.mxu1 %v168_v4  ;;  %v353_v9 = vld [vmem:[%s607_s2] ss:$0 sm:$0xff]  ;;  %v253_v14 = vld [vmem:[#allocation8 + $0x10] sm:$0xff]  ;;  %v251_v16 = vld [vmem:[#allocation8] sm:$0xff]  ;;  %s490_s26 = scalar_lea.vmem %s343_s25, 128  ;;  %p495_p7 = scmp.lt.s32.totalorder %s343_s25, %s343_s25 }
  0x37   :  { %374 = vmatprep.subr.mxu0 %v524_v0  ;;  %381 = vmatprep.subr.mxu1 %v524_v0  ;;  %v252_v15 = vld [vmem:[#allocation8 + $0x8] sm:$0xff]  ;;  %p491_p6 = scmp.ne.s32.totalorder %s343_s25, %s490_s26  ;;  %p496_p8 = scmp.lt.s32.totalorder %s490_s26, %s490_s26 }
  0x38   :  { %375 = vmatpush3.msra.mxu0 %v81_v2  ;;  %382 = vmatpush3.msra.mxu1 %v167_v5  ;;  %v355_v17 = vld [vmem:[%s609_s4] ss:$0 sm:$0xff] }
  0x39   :  { %377 = vmatmul.mubr.msk.f32.vlgmr.msra.gmra.mxu0 %vm90_vm1, %v80_v3  ;;  %390 = vmatprep.subr.mxu0 %v524_v0  ;;  %v357_v22 = vld [vmem:[%s611_s6] ss:$0 sm:$0xff]  ;;  %p497_p9 = por %p496_p8, %p495_p7 }
  0x3a   :  { %398 = vmatprep.mubr.msk.f32.mxu0 %vm525_vm0, %v524_v0  ;;  %383 = vmatprep.subr.mxu1 %v524_v0 }
  0x3b   :  { %384 = vmatpush3.msra.mxu1 %v166_v6  ;;  %391 = vmatpush3.msra.mxu0 %v254_v8  ;;  %p498_p10 = pnand %p497_p9, %p491_p6 }
  0x3c   :  { %385 = vmatprep.subr.mxu1 %v524_v0  ;;  %392 = vmatprep.subr.mxu0 %v524_v0 }
  0x3d   :  { %386 = vmatpush3.msra.mxu1 %v165_v7  ;;  %393 = vmatpush3.msra.mxu0 %v253_v14 }
  0x3e   :  { %394 = vmatprep.subr.mxu0 %v524_v0 }
  0x3f   :  { %395 = vmatpush3.msra.mxu0 %v252_v15 }
  0x40   :  { %396 = vmatprep.subr.mxu0 %v524_v0 }
  0x41   :  { %397 = vmatpush3.msra.mxu0 %v251_v16 }
  0xf9   :  { %v160_v10 = vpop.f32.mrf.mxu0 }
  0xfa   :  { %v161_v11 = vadd.f32 %v353_v9, %v160_v10 }
  0xfb   :  { %v378_v12 = vpop.f32.mrf.mxu0 }
  0xfc   :  { %v164_v13 = vmax.f32 %v161_v11, 0.0 }
  0xfe   :  { %388 = vmatmul.mubr.msk.f32.vlgmr.msra.gmra.mxu1 %vm176_vm2, %v164_v13 }
 0x1be   :  { %v246_v18 = vpop.f32.mrf.mxu1 }
 0x1bf   :  { %v247_v19 = vadd.f32 %v355_v17, %v246_v18 }
 0x1c0   :  { %v389_v20 = vpop.f32.mrf.mxu1 }
 0x1c1   :  { %v250_v21 = vmax.f32 %v247_v19, 0.0 }
 0x1c3   :  { %399 = vmatmul.mubr.msk.f32.vlgmr.msra.gmra.mxu0 %vm176_vm2, %v250_v21 }
 0x283   :  { %v331_v23 = vpop.f32.mrf.mxu0 }
 0x284   :  { %v332_v24 = vadd.f32 %v357_v22, %v331_v23 }
 0x285   :  { %v400_v25 = vpop.f32.mrf.mxu0 }
 0x286   :  { %335 = vst [vmem:[#allocation10] sm:$0xff] %v332_v24 }
 0x287   :  { %501 = shalt.err (!%p498_p10)
}
 0x288   :  { %345 = dma.vmem_to_hbm [thread:$0]  %s343_s25, 128, %s612_s7, [#allocation4]  }
 0x289   :  { %516 = dma.done.wait [#allocation4], 128  }
 0x28a   :  { %517 = vsyncadd [#allocation4], 4294967168 }
 0x28b   :  { %349 = vsyncpa [#allocation3], 1 }
 0x28c   :  { %350 = vsyncpa [#allocation6], 1 }
 0x28d   :  { %351 = vsyncpa [#allocation9], 1 }
 0x28e   :  { %352 = vsyncpa [#allocation4], 1 }

</bundles_post_ra>
